<compile_context>
chip_gen: v7x
topology: tpu7x:2x2x1
jax: 0.10.0
libtpu: 0.0.40
codegen_flags: <defaults>
</compile_context>

<pallas_src>
import functools

import jax
import jax.numpy as jnp
import numpy as np
from jax.experimental import pallas as pl
from jax.experimental.pallas import tpu as pltpu


def rnn_tagger_kernel(x_ref, wih_ref, whh_ref, b_ref, wfc_ref, bfc_ref,
                      out_ref, xw_ref, h_all_ref, *, T, Bp):
    """Single-invocation RNN tagger forward.

    x_ref    : (T*Bp, E)   time-major flattened embeddings
    wih_ref  : (E, H)      W_ih^T
    whh_ref  : (H, H)      W_hh^T
    b_ref    : (1, H)      b_ih + b_hh (fused)
    wfc_ref  : (H, Cp)     W_fc^T, class dim zero-padded to Cp (lane-dense)
    bfc_ref  : (1, Cp)     b_fc, zero-padded
    out_ref  : (T*Bp, Cp)  time-major logits
    xw_ref   : (T*Bp, H)   VMEM scratch: precomputed x @ W_ih^T + b
    h_all_ref: (T*Bp, H)   VMEM scratch: all hidden states
    """
    # 1) Hoisted input projection + fused bias: one large MXU matmul,
    #    completely off the serial recurrence path.
    xw_ref[...] = (
        jnp.dot(x_ref[...], wih_ref[...], preferred_element_type=jnp.float32)
        + b_ref[...]
    )

    whh = whh_ref[...]                      # keep W_hh^T resident across steps
    H = whh.shape[0]

    # 2) Serial recurrence: per step only (Bp, H) @ (H, H) + tanh.
    def step(t, h_prev):
        start = pl.multiple_of(t * Bp, Bp)
        x_pre = xw_ref[pl.ds(start, Bp), :]               # (Bp, H)
        h_new = jnp.tanh(
            x_pre + jnp.dot(h_prev, whh, preferred_element_type=jnp.float32))
        h_all_ref[pl.ds(start, Bp), :] = h_new
        return h_new

    h0 = jnp.zeros((Bp, H), jnp.float32)
    jax.lax.fori_loop(0, T, step, h0, unroll=True)

    # 3) Deferred FC head: one lane-dense matmul + single unmasked store.
    out_ref[...] = (
        jnp.dot(h_all_ref[...], wfc_ref[...], preferred_element_type=jnp.float32)
        + bfc_ref[...]
    )


def rnn_tagger_forward(token_ids, params):
    """token_ids: (B, T) int32.  Returns logits (B, T, C) float32."""
    emb_table = params["embedding"]        # (V, E)
    wih_t = params["w_ih_t"]               # (E, H)
    whh_t = params["w_hh_t"]               # (H, H)
    b = params["b_ih"] + params["b_hh"]    # (1, H) fused bias
    wfc_t = params["w_fc_t"]               # (H, C)
    b_fc = params["b_fc"]                  # (1, C)

    B, T = token_ids.shape
    E, H = wih_t.shape
    C = wfc_t.shape[1]

    # Embedding lookup (data-dependent gather) stays in XLA.
    embeds = jnp.take(emb_table, token_ids, axis=0)        # (B, T, E) f32

    # Pad batch to a full sublane group, class dim to a full lane width.
    Bp = max(8, -(-B // 8) * 8)
    Cp = max(128, -(-C // 128) * 128)
    embeds_p = jnp.pad(embeds, ((0, Bp - B), (0, 0), (0, 0)))
    wfc_p = jnp.pad(wfc_t, ((0, 0), (0, Cp - C)))
    bfc_p = jnp.pad(b_fc, ((0, 0), (0, Cp - C)))

    # Time-major flatten so each step's Bp rows are contiguous: (T*Bp, E).
    x_flat = jnp.transpose(embeds_p, (1, 0, 2)).reshape(T * Bp, E)

    kernel = functools.partial(rnn_tagger_kernel, T=T, Bp=Bp)
    vmem = pl.BlockSpec(memory_space=pltpu.MemorySpace.VMEM)

    out_flat = pl.pallas_call(
        kernel,
        out_shape=jax.ShapeDtypeStruct((T * Bp, Cp), jnp.float32),
        in_specs=[vmem] * 6,
        out_specs=vmem,
        scratch_shapes=[
            pltpu.VMEM((T * Bp, H), jnp.float32),   # x @ W_ih^T + b (precomputed)
            pltpu.VMEM((T * Bp, H), jnp.float32),   # all hidden states
        ],
    )(x_flat, wih_t, whh_t, b, wfc_p, bfc_p)

    # Back to batch-major, drop batch / class padding.
    logits = jnp.transpose(out_flat.reshape(T, Bp, Cp), (1, 0, 2))[:B, :, :C]
    return logits


def rnn_tagger_reference(token_ids, params):
    """Pure-JAX reference matching torch nn.Embedding + nn.RNN + nn.Linear."""
    embeds = jnp.take(params["embedding"], token_ids, axis=0)   # (B, T, E)
    B = embeds.shape[0]
    H = params["w_hh_t"].shape[0]

    def step(h, x_t):
        h_new = jnp.tanh(x_t @ params["w_ih_t"] + params["b_ih"]
                         + h @ params["w_hh_t"] + params["b_hh"])
        return h_new, h_new

    h0 = jnp.zeros((B, H), jnp.float32)
    _, hs = jax.lax.scan(step, h0, jnp.swapaxes(embeds, 0, 1))  # (T, B, H)
    rnn_out = jnp.swapaxes(hs, 0, 1)                            # (B, T, H)
    return rnn_out @ params["w_fc_t"] + params["b_fc"]


def init_params(key, vocab_size, embedding_dim, hidden_dim, tagset_size):
    ks = jax.random.split(key, 7)
    scale = 0.1
    emb = scale * jax.random.normal(ks[0], (vocab_size, embedding_dim), jnp.float32)
    emb = emb.at[0].set(0.0)   # padding_idx=0 row zeroed like nn.Embedding
    w_ih = scale * jax.random.normal(ks[1], (hidden_dim, embedding_dim), jnp.float32)
    w_hh = scale * jax.random.normal(ks[2], (hidden_dim, hidden_dim), jnp.float32)
    b_ih = scale * jax.random.normal(ks[3], (hidden_dim,), jnp.float32)
    b_hh = scale * jax.random.normal(ks[4], (hidden_dim,), jnp.float32)
    w_fc = scale * jax.random.normal(ks[5], (tagset_size, hidden_dim), jnp.float32)
    b_fc = scale * jax.random.normal(ks[6], (tagset_size,), jnp.float32)
    return {
        "embedding": emb,
        "w_ih_t": w_ih.T,                 # (E, H)
        "w_hh_t": w_hh.T,                 # (H, H)
        "b_ih": b_ih[None, :],            # (1, H)
        "b_hh": b_hh[None, :],            # (1, H)
        "w_fc_t": w_fc.T,                 # (H, C)
        "b_fc": b_fc[None, :],            # (1, C)
    }


if __name__ == "__main__":
    # Small synthetic shapes consistent with the module's forward.
    vocab_size = 50
    embedding_dim = 32
    hidden_dim = 128
    tagset_size = 3          # {'O','B','I'}
    batch = 2
    seq_len = 8

    key = jax.random.PRNGKey(0)
    k_params, k_tokens = jax.random.split(key)
    params = init_params(k_params, vocab_size, embedding_dim, hidden_dim, tagset_size)
    token_ids = jax.random.randint(k_tokens, (batch, seq_len), 0, vocab_size,
                                   dtype=jnp.int32)

    logits = rnn_tagger_forward(token_ids, params)
    logits = jax.block_until_ready(logits)

    ref = jax.block_until_ready(rnn_tagger_reference(token_ids, params))
    max_err = float(jnp.max(jnp.abs(logits - ref)))
    if logits.shape != (batch, seq_len, tagset_size) or not np.isfinite(max_err) \
            or max_err > 5e-2:
        raise RuntimeError(f"mismatch vs reference: max_err={max_err}")

    print("KERNEL_OK")
</pallas_src>

<mosaic_0001>
module attributes {stable_mosaic.version = 11 : i64} {
  func.func @rnn_tagger_kernel(%arg0: memref<64x32xf32, #tpu.memory_space<vmem>>, %arg1: memref<32x128xf32, #tpu.memory_space<vmem>>, %arg2: memref<128x128xf32, #tpu.memory_space<vmem>>, %arg3: memref<1x128xf32, #tpu.memory_space<vmem>>, %arg4: memref<128x128xf32, #tpu.memory_space<vmem>>, %arg5: memref<1x128xf32, #tpu.memory_space<vmem>>, %arg6: memref<64x128xf32, #tpu.memory_space<vmem>>, %arg7: memref<64x128xf32, #tpu.memory_space<vmem>>, %arg8: memref<64x128xf32, #tpu.memory_space<vmem>>) attributes {dimension_semantics = [], scalar_prefetch = 0 : i64, scratch_operands = 2 : i64, tpu.core_type = #tpu.core_type<tc>} {
    %c0 = arith.constant 0 : index
    %c0_0 = arith.constant 0 : index
    %0 = vector.load %arg0[%c0, %c0_0] : memref<64x32xf32, #tpu.memory_space<vmem>>, vector<64x32xf32>
    %c0_1 = arith.constant 0 : index
    %c0_2 = arith.constant 0 : index
    %1 = vector.load %arg1[%c0_1, %c0_2] : memref<32x128xf32, #tpu.memory_space<vmem>>, vector<32x128xf32>
    %cst = arith.constant dense<0.000000e+00> : vector<64x128xf32>
    %2 = tpu.matmul %0, %1, %cst {dimension_numbers = #tpu.dot_dimension_numbers<[1], [0], [0], [1], [0, 0, 1, 1], [], []>} : vector<64x32xf32>, vector<32x128xf32>, vector<64x128xf32> -> vector<64x128xf32>
    %c0_3 = arith.constant 0 : index
    %c0_4 = arith.constant 0 : index
    %3 = vector.load %arg3[%c0_3, %c0_4] : memref<1x128xf32, #tpu.memory_space<vmem>>, vector<1x128xf32>
    %4 = vector.broadcast %3 : vector<1x128xf32> to vector<64x128xf32>
    %5 = arith.addf %2, %4 : vector<64x128xf32>
    %c0_5 = arith.constant 0 : index
    %c0_6 = arith.constant 0 : index
    %6 = vector.load %arg7[%c0_5, %c0_6] : memref<64x128xf32, #tpu.memory_space<vmem>>, vector<64x128xf32>
    tpu.vector_store %arg7[%c0_5, %c0_6], %5 {strides = array<i32>} : memref<64x128xf32, #tpu.memory_space<vmem>>, vector<64x128xf32>,
    %c0_7 = arith.constant 0 : index
    %c0_8 = arith.constant 0 : index
    %7 = vector.load %arg2[%c0_7, %c0_8] : memref<128x128xf32, #tpu.memory_space<vmem>>, vector<128x128xf32>
    %cst_9 = arith.constant 0.000000e+00 : f32
    %8 = vector.broadcast %cst_9 : f32 to vector<8x128xf32>
    %c0_i32 = arith.constant 0 : i32
    %c8_i32 = arith.constant 8 : i32
    %9 = arith.muli %c0_i32, %c8_i32 : i32
    %10 = tpu.assume_multiple %9, 8 : i32
    %11 = arith.index_cast %10 : i32 to index
    %c0_10 = arith.constant 0 : index
    %12 = vector.load %arg7[%11, %c0_10] : memref<64x128xf32, #tpu.memory_space<vmem>>, vector<8x128xf32>
    %cst_11 = arith.constant dense<0.000000e+00> : vector<8x128xf32>
    %13 = tpu.matmul %8, %7, %cst_11 {dimension_numbers = #tpu.dot_dimension_numbers<[1], [0], [0], [1], [0, 0, 1, 1], [], []>} : vector<8x128xf32>, vector<128x128xf32>, vector<8x128xf32> -> vector<8x128xf32>
    %14 = arith.addf %12, %13 : vector<8x128xf32>
    %15 = math.tanh %14 : vector<8x128xf32>
    %16 = arith.index_cast %10 : i32 to index
    %c0_12 = arith.constant 0 : index
    %17 = vector.load %arg8[%16, %c0_12] : memref<64x128xf32, #tpu.memory_space<vmem>>, vector<8x128xf32>
    tpu.vector_store %arg8[%16, %c0_12], %15 {strides = array<i32>} : memref<64x128xf32, #tpu.memory_space<vmem>>, vector<8x128xf32>,
    %c1_i32 = arith.constant 1 : i32
    %c8_i32_13 = arith.constant 8 : i32
    %18 = arith.muli %c1_i32, %c8_i32_13 : i32
    %19 = tpu.assume_multiple %18, 8 : i32
    %20 = arith.index_cast %19 : i32 to index
    %c0_14 = arith.constant 0 : index
    %21 = vector.load %arg7[%20, %c0_14] : memref<64x128xf32, #tpu.memory_space<vmem>>, vector<8x128xf32>
    %cst_15 = arith.constant dense<0.000000e+00> : vector<8x128xf32>
    %22 = tpu.matmul %15, %7, %cst_15 {dimension_numbers = #tpu.dot_dimension_numbers<[1], [0], [0], [1], [0, 0, 1, 1], [], []>} : vector<8x128xf32>, vector<128x128xf32>, vector<8x128xf32> -> vector<8x128xf32>
    %23 = arith.addf %21, %22 : vector<8x128xf32>
    %24 = math.tanh %23 : vector<8x128xf32>
    %25 = arith.index_cast %19 : i32 to index
    %c0_16 = arith.constant 0 : index
    %26 = vector.load %arg8[%25, %c0_16] : memref<64x128xf32, #tpu.memory_space<vmem>>, vector<8x128xf32>
    tpu.vector_store %arg8[%25, %c0_16], %24 {strides = array<i32>} : memref<64x128xf32, #tpu.memory_space<vmem>>, vector<8x128xf32>,
    %c2_i32 = arith.constant 2 : i32
    %c8_i32_17 = arith.constant 8 : i32
    %27 = arith.muli %c2_i32, %c8_i32_17 : i32
    %28 = tpu.assume_multiple %27, 8 : i32
    %29 = arith.index_cast %28 : i32 to index
    %c0_18 = arith.constant 0 : index
    %30 = vector.load %arg7[%29, %c0_18] : memref<64x128xf32, #tpu.memory_space<vmem>>, vector<8x128xf32>
    %cst_19 = arith.constant dense<0.000000e+00> : vector<8x128xf32>
    %31 = tpu.matmul %24, %7, %cst_19 {dimension_numbers = #tpu.dot_dimension_numbers<[1], [0], [0], [1], [0, 0, 1, 1], [], []>} : vector<8x128xf32>, vector<128x128xf32>, vector<8x128xf32> -> vector<8x128xf32>
    %32 = arith.addf %30, %31 : vector<8x128xf32>
    %33 = math.tanh %32 : vector<8x128xf32>
    %34 = arith.index_cast %28 : i32 to index
    %c0_20 = arith.constant 0 : index
    %35 = vector.load %arg8[%34, %c0_20] : memref<64x128xf32, #tpu.memory_space<vmem>>, vector<8x128xf32>
    tpu.vector_store %arg8[%34, %c0_20], %33 {strides = array<i32>} : memref<64x128xf32, #tpu.memory_space<vmem>>, vector<8x128xf32>,
    %c3_i32 = arith.constant 3 : i32
    %c8_i32_21 = arith.constant 8 : i32
    %36 = arith.muli %c3_i32, %c8_i32_21 : i32
    %37 = tpu.assume_multiple %36, 8 : i32
    %38 = arith.index_cast %37 : i32 to index
    %c0_22 = arith.constant 0 : index
    %39 = vector.load %arg7[%38, %c0_22] : memref<64x128xf32, #tpu.memory_space<vmem>>, vector<8x128xf32>
    %cst_23 = arith.constant dense<0.000000e+00> : vector<8x128xf32>
    %40 = tpu.matmul %33, %7, %cst_23 {dimension_numbers = #tpu.dot_dimension_numbers<[1], [0], [0], [1], [0, 0, 1, 1], [], []>} : vector<8x128xf32>, vector<128x128xf32>, vector<8x128xf32> -> vector<8x128xf32>
    %41 = arith.addf %39, %40 : vector<8x128xf32>
    %42 = math.tanh %41 : vector<8x128xf32>
    %43 = arith.index_cast %37 : i32 to index
    %c0_24 = arith.constant 0 : index
    %44 = vector.load %arg8[%43, %c0_24] : memref<64x128xf32, #tpu.memory_space<vmem>>, vector<8x128xf32>
    tpu.vector_store %arg8[%43, %c0_24], %42 {strides = array<i32>} : memref<64x128xf32, #tpu.memory_space<vmem>>, vector<8x128xf32>,
    %c4_i32 = arith.constant 4 : i32
    %c8_i32_25 = arith.constant 8 : i32
    %45 = arith.muli %c4_i32, %c8_i32_25 : i32
    %46 = tpu.assume_multiple %45, 8 : i32
    %47 = arith.index_cast %46 : i32 to index
    %c0_26 = arith.constant 0 : index
    %48 = vector.load %arg7[%47, %c0_26] : memref<64x128xf32, #tpu.memory_space<vmem>>, vector<8x128xf32>
    %cst_27 = arith.constant dense<0.000000e+00> : vector<8x128xf32>
    %49 = tpu.matmul %42, %7, %cst_27 {dimension_numbers = #tpu.dot_dimension_numbers<[1], [0], [0], [1], [0, 0, 1, 1], [], []>} : vector<8x128xf32>, vector<128x128xf32>, vector<8x128xf32> -> vector<8x128xf32>
    %50 = arith.addf %48, %49 : vector<8x128xf32>
    %51 = math.tanh %50 : vector<8x128xf32>
    %52 = arith.index_cast %46 : i32 to index
    %c0_28 = arith.constant 0 : index
    %53 = vector.load %arg8[%52, %c0_28] : memref<64x128xf32, #tpu.memory_space<vmem>>, vector<8x128xf32>
    tpu.vector_store %arg8[%52, %c0_28], %51 {strides = array<i32>} : memref<64x128xf32, #tpu.memory_space<vmem>>, vector<8x128xf32>,
    %c5_i32 = arith.constant 5 : i32
    %c8_i32_29 = arith.constant 8 : i32
    %54 = arith.muli %c5_i32, %c8_i32_29 : i32
    %55 = tpu.assume_multiple %54, 8 : i32
    %56 = arith.index_cast %55 : i32 to index
    %c0_30 = arith.constant 0 : index
    %57 = vector.load %arg7[%56, %c0_30] : memref<64x128xf32, #tpu.memory_space<vmem>>, vector<8x128xf32>
    %cst_31 = arith.constant dense<0.000000e+00> : vector<8x128xf32>
    %58 = tpu.matmul %51, %7, %cst_31 {dimension_numbers = #tpu.dot_dimension_numbers<[1], [0], [0], [1], [0, 0, 1, 1], [], []>} : vector<8x128xf32>, vector<128x128xf32>, vector<8x128xf32> -> vector<8x128xf32>
    %59 = arith.addf %57, %58 : vector<8x128xf32>
    %60 = math.tanh %59 : vector<8x128xf32>
    %61 = arith.index_cast %55 : i32 to index
    %c0_32 = arith.constant 0 : index
    %62 = vector.load %arg8[%61, %c0_32] : memref<64x128xf32, #tpu.memory_space<vmem>>, vector<8x128xf32>
    tpu.vector_store %arg8[%61, %c0_32], %60 {strides = array<i32>} : memref<64x128xf32, #tpu.memory_space<vmem>>, vector<8x128xf32>,
    %c6_i32 = arith.constant 6 : i32
    %c8_i32_33 = arith.constant 8 : i32
    %63 = arith.muli %c6_i32, %c8_i32_33 : i32
    %64 = tpu.assume_multiple %63, 8 : i32
    %65 = arith.index_cast %64 : i32 to index
    %c0_34 = arith.constant 0 : index
    %66 = vector.load %arg7[%65, %c0_34] : memref<64x128xf32, #tpu.memory_space<vmem>>, vector<8x128xf32>
    %cst_35 = arith.constant dense<0.000000e+00> : vector<8x128xf32>
    %67 = tpu.matmul %60, %7, %cst_35 {dimension_numbers = #tpu.dot_dimension_numbers<[1], [0], [0], [1], [0, 0, 1, 1], [], []>} : vector<8x128xf32>, vector<128x128xf32>, vector<8x128xf32> -> vector<8x128xf32>
    %68 = arith.addf %66, %67 : vector<8x128xf32>
    %69 = math.tanh %68 : vector<8x128xf32>
    %70 = arith.index_cast %64 : i32 to index
    %c0_36 = arith.constant 0 : index
    %71 = vector.load %arg8[%70, %c0_36] : memref<64x128xf32, #tpu.memory_space<vmem>>, vector<8x128xf32>
    tpu.vector_store %arg8[%70, %c0_36], %69 {strides = array<i32>} : memref<64x128xf32, #tpu.memory_space<vmem>>, vector<8x128xf32>,
    %c7_i32 = arith.constant 7 : i32
    %c8_i32_37 = arith.constant 8 : i32
    %72 = arith.muli %c7_i32, %c8_i32_37 : i32
    %73 = tpu.assume_multiple %72, 8 : i32
    %74 = arith.index_cast %73 : i32 to index
    %c0_38 = arith.constant 0 : index
    %75 = vector.load %arg7[%74, %c0_38] : memref<64x128xf32, #tpu.memory_space<vmem>>, vector<8x128xf32>
    %cst_39 = arith.constant dense<0.000000e+00> : vector<8x128xf32>
    %76 = tpu.matmul %69, %7, %cst_39 {dimension_numbers = #tpu.dot_dimension_numbers<[1], [0], [0], [1], [0, 0, 1, 1], [], []>} : vector<8x128xf32>, vector<128x128xf32>, vector<8x128xf32> -> vector<8x128xf32>
    %77 = arith.addf %75, %76 : vector<8x128xf32>
    %78 = math.tanh %77 : vector<8x128xf32>
    %79 = arith.index_cast %73 : i32 to index
    %c0_40 = arith.constant 0 : index
    %80 = vector.load %arg8[%79, %c0_40] : memref<64x128xf32, #tpu.memory_space<vmem>>, vector<8x128xf32>
    tpu.vector_store %arg8[%79, %c0_40], %78 {strides = array<i32>} : memref<64x128xf32, #tpu.memory_space<vmem>>, vector<8x128xf32>,
    %c8_i32_41 = arith.constant 8 : i32
    %c0_42 = arith.constant 0 : index
    %c0_43 = arith.constant 0 : index
    %81 = vector.load %arg8[%c0_42, %c0_43] : memref<64x128xf32, #tpu.memory_space<vmem>>, vector<64x128xf32>
    %c0_44 = arith.constant 0 : index
    %c0_45 = arith.constant 0 : index
    %82 = vector.load %arg4[%c0_44, %c0_45] : memref<128x128xf32, #tpu.memory_space<vmem>>, vector<128x128xf32>
    %cst_46 = arith.constant dense<0.000000e+00> : vector<64x128xf32>
    %83 = tpu.matmul %81, %82, %cst_46 {dimension_numbers = #tpu.dot_dimension_numbers<[1], [0], [0], [1], [0, 0, 1, 1], [], []>} : vector<64x128xf32>, vector<128x128xf32>, vector<64x128xf32> -> vector<64x128xf32>
    %c0_47 = arith.constant 0 : index
    %c0_48 = arith.constant 0 : index
    %84 = vector.load %arg5[%c0_47, %c0_48] : memref<1x128xf32, #tpu.memory_space<vmem>>, vector<1x128xf32>
    %85 = vector.broadcast %84 : vector<1x128xf32> to vector<64x128xf32>
    %86 = arith.addf %83, %85 : vector<64x128xf32>
    %c0_49 = arith.constant 0 : index
    %c0_50 = arith.constant 0 : index
    %87 = vector.load %arg6[%c0_49, %c0_50] : memref<64x128xf32, #tpu.memory_space<vmem>>, vector<64x128xf32>
    tpu.vector_store %arg6[%c0_49, %c0_50], %86 {strides = array<i32>} : memref<64x128xf32, #tpu.memory_space<vmem>>, vector<64x128xf32>,
    return
  }
}

</mosaic_0001>

<bundles_post_ra>
// kernel: tpu_custom_call.1
= control target key start
LH: loop header
LB: loop body
LE: loop exit
PB: predicated region body
PF: predicated region fallthrough
CT: control target
= control target key end

     0   :  { %11 = vsyncpa [#allocation5], 0  ;;  %s2185_s0 = inlined_call_operand.vmem [shape: f32[64,32], index: 0, kind: input, shape index: {}]   ;;  %s2186_s1 = inlined_call_operand.vmem [shape: f32[32,128], index: 1, kind: input, shape index: {}]   ;;  %s2187_s2 = inlined_call_operand.hbm [shape: f32[128,128], index: 2, kind: input, shape index: {}]   ;;  %s2188_s3 = inlined_call_operand.vmem [shape: f32[1,128], index: 3, kind: input, shape index: {}]   ;;  %s2189_s4 = inlined_call_operand.hbm [shape: f32[128,128], index: 4, kind: input, shape index: {}]   ;;  %s2190_s5 = inlined_call_operand.vmem [shape: f32[1,128], index: 5, kind: input, shape index: {}]   ;;  %s2191_s6 = inlined_call_operand.hbm [shape: f32[64,128], index: 6, kind: output, shape index: {}]  }
   0x1   :  { %12 = vsyncpa [#allocation8], 0 }
   0x2   :  { %13 = vsyncpa [#allocation6], 0  ;;  %s1847_s21 = smov [#allocation4]   ;;  %s1775_s25 = scalar_lea.hbm %s2187_s2, 2048 }
   0x3   :  { %s23_s22 = sshll.u32 %s1847_s21, 4  ;;  %p1776_p0 = scmp.ne.s32.totalorder %s2187_s2, %s1775_s25  ;;  %s24_s22 = int_to_ptr.vmem [resolvable:$true] %s23_s22 }
   0x4   :  { %p1779_p1 = scmp.lt.u32.totalorder %s1775_s25, %s2187_s2 }
   0x6   :  { %p1781_p2 = pnand %p1779_p1, %p1776_p0 }
   0x8   :  { %1784 = shalt.err (!%p1781_p2)
}
   0x9   :  { %s1785_s30 = scalar_lea.vmem %s24_s22, 2048  ;;  %p1790_p4 = scmp.lt.s32.totalorder %s24_s22, %s24_s22 }
   0xa   :  { %p1786_p3 = scmp.ne.s32.totalorder %s24_s22, %s1785_s30  ;;  %p1791_p5 = scmp.lt.s32.totalorder %s1785_s30, %s1785_s30 }
   0xc   :  { %p1792_p6 = por %p1791_p5, %p1790_p4 }
   0xe   :  { %p1793_p7 = pnand %p1792_p6, %p1786_p3 }
  0x10   :  { %1796 = shalt.err (!%p1793_p7)
}
  0x11   :  { %s1848_s7 = smov 128   ;;  %s1849_s8 = smov 8  }
  0x12   :  { %29 = dma.hbm_to_vmem [thread:$0]  %s2187_s2, 2048, %s24_s22, [#allocation5], %s1848_s7, %s1848_s7, %s1849_s8  }
  0x13   :  { %s1850_s11 = smov [#allocation7]   ;;  %s1797_s15 = scalar_lea.hbm %s2189_s4, 2048 }
  0x14   :  { %s37_s12 = sshll.u32 %s1850_s11, 4  ;;  %p1798_p8 = scmp.ne.s32.totalorder %s2189_s4, %s1797_s15  ;;  %s38_s12 = int_to_ptr.vmem [resolvable:$true] %s37_s12 }
  0x15   :  { %p1801_p9 = scmp.lt.u32.totalorder %s1797_s15, %s2189_s4 }
  0x17   :  { %p1803_p10 = pnand %p1801_p9, %p1798_p8 }
  0x19   :  { %1806 = shalt.err (!%p1803_p10)
}
  0x1a   :  { %s1807_s20 = scalar_lea.vmem %s38_s12, 2048  ;;  %p1812_p12 = scmp.lt.s32.totalorder %s38_s12, %s38_s12 }
  0x1b   :  { %p1808_p11 = scmp.ne.s32.totalorder %s38_s12, %s1807_s20  ;;  %p1813_p13 = scmp.lt.s32.totalorder %s1807_s20, %s1807_s20 }
  0x1d   :  { %p1814_p0 = por %p1813_p13, %p1812_p12 }
  0x1f   :  { %p1815_p1 = pnand %p1814_p0, %p1808_p11 }
  0x21   :  { %1818 = shalt.err (!%p1815_p1)
}
  0x22   :  { %43 = dma.hbm_to_vmem [thread:$0]  %s2189_s4, 2048, %s38_s12, [#allocation8], %s1848_s7, %s1848_s7, %s1849_s8  }
  0x23   :  { %1841 = dma.done.wait [#allocation5], 2048  }
  0x24   :  { %1842 = vsyncadd [#allocation5], 4294965248 }
  0x25   :  { %1843 = dma.done.wait [#allocation8], 2048  }
  0x26   :  { %1844 = vsyncadd [#allocation8], 4294965248  ;;  %v1851_v0 = vmov 0.0|0.0   ;;  %vm1852_vm0 = vmmov 0   ;;  %v1853_v1 = vmov 0.0   ;;  %v209_v2 = vld [vmem:[#allocation4] sm:$0xff] }
  0x27   :  { %1527 = vmatprep.subr.bf16.mxu0 %v1851_v0  ;;  %1227 = vmatprep.mubr.msk.f32.mxu0 %vm1852_vm0, %v1853_v1  ;;  %v210_v3 = vld [vmem:[#allocation4 + $0x8] sm:$0xff]  ;;  %v211_v4 = vld [vmem:[#allocation4 + $0x10] sm:$0xff]  ;;  %v212_v6 = vld [vmem:[#allocation4 + $0x18] sm:$0xff]  ;;  %vm71_vm1 = vcmask 261120  }
  0x28   :  { %v1923_v5 = vpack.c.bf16 %v210_v3, %v209_v2  ;;  %v1926_v7 = vpack.c.bf16 %v212_v6, %v211_v4  ;;  %v60_v8 = vld [vmem:[%s2186_s1] sm:$0xff]  ;;  %v61_v9 = vld [vmem:[%s2186_s1 + $0x8] sm:$0xff]  ;;  %v62_v13 = vld [vmem:[%s2186_s1 + $0x10] sm:$0xff] }
  0x29   :  { %v213_v10 = vld [vmem:[#allocation4 + $0x20] sm:$0xff]  ;;  %v214_v11 = vld [vmem:[#allocation4 + $0x28] sm:$0xff]  ;;  %v1519_v12 = vpack.c.bf16 %v61_v9, %v60_v8  ;;  %v63_v14 = vld [vmem:[%s2186_s1 + $0x18] sm:$0xff] }
  0x2a   :  { %1529 = vmatpush3.bf16.msra.mxu0 %v1923_v5  ;;  %v1523_v15 = vpack.c.bf16 %v63_v14, %v62_v13  ;;  %v52_v16 = vld [vmem:[%s2185_s0] sm:$0xff]  ;;  %v1945_v17 = vpack.c.bf16 %v214_v11, %v213_v10  ;;  %v215_v18 = vld [vmem:[#allocation4 + $0x30] sm:$0xff]  ;;  %v216_v19 = vld [vmem:[#allocation4 + $0x38] sm:$0xff] }
  0x2b   :  { %1530 = vmatprep.subr.bf16.mxu0 %v1851_v0  ;;  %1520 = vmatprep.subr.bf16.mxu1 %v1519_v12  ;;  %v1950_v20 = vpack.c.bf16 %v216_v19, %v215_v18  ;;  %v53_v21 = vld [vmem:[%s2185_s0 + $0x8] sm:$0xff]  ;;  %v217_v22 = vld [vmem:[#allocation4 + $0x40] sm:$0xff]  ;;  %v219_v25 = vld [vmem:[#allocation4 + $0x50] sm:$0xff] }
  0x2c   :  { %1522 = vmatpush3.bf16.msra.mxu1 %v1519_v12  ;;  %1183 = vmatprep.mubr.msk.f32.mxu1 %vm71_vm1, %v52_v16  ;;  %v218_v23 = vld [vmem:[#allocation4 + $0x48] sm:$0xff]  ;;  %v220_v26 = vld [vmem:[#allocation4 + $0x58] sm:$0xff]  ;;  %v221_v28 = vld [vmem:[#allocation4 + $0x60] sm:$0xff] }
  0x2d   :  { %1524 = vmatprep.subr.bf16.mxu1 %v1523_v15  ;;  %v1959_v24 = vpack.c.bf16 %v218_v23, %v217_v22  ;;  %v1965_v27 = vpack.c.bf16 %v220_v26, %v219_v25  ;;  %v222_v29 = vld [vmem:[#allocation4 + $0x68] sm:$0xff]  ;;  %v223_v31 = vld [vmem:[#allocation4 + $0x70] sm:$0xff]  ;;  %v224_v32 = vld [vmem:[#allocation4 + $0x78] sm:$0xff] }
  0x2e   :  { %1532 = vmatpush3.bf16.msra.mxu0 %v1926_v7  ;;  %v1971_v30 = vpack.c.bf16 %v222_v29, %v221_v28  ;;  %v1977_v33 = vpack.c.bf16 %v224_v32, %v223_v31  ;;  %v54_v34 = vld [vmem:[%s2185_s0 + $0x10] sm:$0xff]  ;;  %v2018_v37 = vld [vmem:[%s2188_s3] ss:$0 sm:$0xff]  ;;  %v55_v43 = vld [vmem:[%s2185_s0 + $0x18] sm:$0xff] }
  0x2f   :  { %1533 = vmatprep.subr.bf16.mxu0 %v1851_v0  ;;  %v56_v44 = vld [vmem:[%s2185_s0 + $0x20] sm:$0xff]  ;;  %v57_v45 = vld [vmem:[%s2185_s0 + $0x28] sm:$0xff]  ;;  %v58_v46 = vld [vmem:[%s2185_s0 + $0x30] sm:$0xff] }
  0x30   :  { %1526 = vmatpush3.bf16.msra.mxu1 %v1523_v15  ;;  %v59_v47 = vld [vmem:[%s2185_s0 + $0x38] sm:$0xff]  ;;  %v841_v18 = vld [vmem:[#allocation7 + $0x10] sm:$0xff]  ;;  %v843_v22 = vld [vmem:[#allocation7 + $0x20] sm:$0xff] }
  0x31   :  { %1575 = vmatprep.subr.bf16.mxu1 %v1851_v0  ;;  %v842_v19 = vld [vmem:[#allocation7 + $0x18] sm:$0xff]  ;;  %v844_v23 = vld [vmem:[#allocation7 + $0x28] sm:$0xff] }
  0x32   :  { %1535 = vmatpush3.bf16.msra.mxu0 %v1945_v17  ;;  %v846_v25 = vld [vmem:[#allocation7 + $0x38] sm:$0xff]  ;;  %v848_v28 = vld [vmem:[#allocation7 + $0x48] sm:$0xff] }
  0x33   :  { %1536 = vmatprep.subr.bf16.mxu0 %v1851_v0  ;;  %1184 = vmatmul.mubr.msk.f32.vlgmr.msra.gmra.mrb[0].mxu1 %vm71_vm1, %v53_v21  ;;  %v850_v31 = vld [vmem:[#allocation7 + $0x58] sm:$0xff] }
  0x34   :  { %1577 = vmatpush3.bf16.msra.mxu1 %v1923_v5  ;;  %1186 = vmatprep.mubr.msk.f32.mxu1 %vm71_vm1, %v54_v34  ;;  %v852_v34 = vld [vmem:[#allocation7 + $0x68] sm:$0xff] }
  0x35   :  { %1578 = vmatprep.subr.bf16.mxu1 %v1851_v0 }
  0x36   :  { %1538 = vmatpush3.bf16.msra.mxu0 %v1950_v20 }
  0x37   :  { %1539 = vmatprep.subr.bf16.mxu0 %v1851_v0  ;;  %1187 = vmatmul.mubr.msk.f32.gmra.mrb[2].mxu1 %vm71_vm1, %v55_v43 }
  0x38   :  { %1580 = vmatpush3.bf16.msra.mxu1 %v1926_v7  ;;  %1189 = vmatprep.mubr.msk.f32.mxu1 %vm71_vm1, %v56_v44 }
  0x39   :  { %1581 = vmatprep.subr.bf16.mxu1 %v1851_v0 }
  0x3a   :  { %1541 = vmatpush3.bf16.msra.mxu0 %v1959_v24 }
  0x3b   :  { %1542 = vmatprep.subr.bf16.mxu0 %v1851_v0  ;;  %1190 = vmatmul.mubr.msk.f32.gmra.mrb[4].mxu1 %vm71_vm1, %v57_v45  ;;  %v1002_v45 = vld [vmem:[%s2190_s5] ss:$0 sm:$0xff]  ;;  %s1854_s5 = smov [#allocation9]  }
  0x3c   :  { %1583 = vmatpush3.bf16.msra.mxu1 %v1945_v17  ;;  %1192 = vmatprep.mubr.msk.f32.mxu1 %vm71_vm1, %v58_v46  ;;  %s980_s22 = sshll.u32 %s1854_s5, 4  ;;  %s981_s22 = int_to_ptr.vmem [resolvable:$true] %s980_s22 }
  0x3d   :  { %1584 = vmatprep.subr.bf16.mxu1 %v1851_v0  ;;  %s1819_s23 = scalar_lea.vmem %s981_s22, 1024  ;;  %p1824_p3 = scmp.lt.s32.totalorder %s981_s22, %s981_s22 }
  0x3e   :  { %1544 = vmatpush3.bf16.msra.mxu0 %v1965_v27  ;;  %p1820_p2 = scmp.ne.s32.totalorder %s981_s22, %s1819_s23  ;;  %p1825_p4 = scmp.lt.s32.totalorder %s1819_s23, %s1819_s23 }
  0x3f   :  { %1545 = vmatprep.subr.bf16.mxu0 %v1851_v0  ;;  %1193 = vmatmul.mubr.msk.f32.gmra.mrb[6].mxu1 %vm71_vm1, %v59_v47 }
  0x40   :  { %1586 = vmatpush3.bf16.msra.mxu1 %v1950_v20  ;;  %1297 = vmatprep.mubr.msk.f32.mxu1 %vm1852_vm0, %v1853_v1  ;;  %p1826_p5 = por %p1825_p4, %p1824_p3 }
  0x41   :  { %1587 = vmatprep.subr.bf16.mxu1 %v1851_v0 }
  0x42   :  { %1547 = vmatpush3.bf16.msra.mxu0 %v1971_v30  ;;  %p1827_p6 = pnand %p1826_p5, %p1820_p2 }
  0x43   :  { %1548 = vmatprep.subr.bf16.mxu0 %v1851_v0 }
  0x44   :  { %1589 = vmatpush3.bf16.msra.mxu1 %v1959_v24 }
  0x45   :  { %1590 = vmatprep.subr.bf16.mxu1 %v1851_v0 }
  0x46   :  { %1550 = vmatpush3.bf16.msra.mxu0 %v1977_v33 }
  0x47   :  { %1551 = vmatprep.subr.bf16.mxu0 %v1851_v0 }
  0x48   :  { %1592 = vmatpush3.bf16.msra.mxu1 %v1965_v27 }
  0x49   :  { %1228 = vmatmul.mubr.f32.vlgmr.msra.gmra.mrb[0].mxu0 %v1853_v1  ;;  %1593 = vmatprep.subr.bf16.mxu1 %v1851_v0 }
  0x4a   :  { %1553 = vmatpush3.bf16.msra.mxu0 %v1923_v5  ;;  %1262 = vmatprep.mubr.msk.f32.mxu0 %vm1852_vm0, %v1853_v1 }
  0x4b   :  { %1554 = vmatprep.subr.bf16.mxu0 %v1851_v0 }
  0x4c   :  { %1595 = vmatpush3.bf16.msra.mxu1 %v1971_v30 }
  0x4d   :  { %1596 = vmatprep.subr.bf16.mxu1 %v1851_v0 }
  0x4e   :  { %1556 = vmatpush3.bf16.msra.mxu0 %v1926_v7 }
  0x4f   :  { %1557 = vmatprep.subr.bf16.mxu0 %v1851_v0 }
  0x50   :  { %1598 = vmatpush3.bf16.msra.mxu1 %v1977_v33 }
  0x51   :  { %1623 = vmatprep.subr.bf16.mxu1 %v1851_v0 }
  0x52   :  { %1559 = vmatpush3.bf16.msra.mxu0 %v1945_v17 }
  0x53   :  { %1560 = vmatprep.subr.bf16.mxu0 %v1851_v0 }
  0x56   :  { %1562 = vmatpush3.bf16.msra.mxu0 %v1950_v20 }
  0x57   :  { %1563 = vmatprep.subr.bf16.mxu0 %v1851_v0 }
  0x5a   :  { %1565 = vmatpush3.bf16.msra.mxu0 %v1959_v24 }
  0x5b   :  { %1566 = vmatprep.subr.bf16.mxu0 %v1851_v0 }
  0x5e   :  { %1568 = vmatpush3.bf16.msra.mxu0 %v1965_v27 }
  0x5f   :  { %1569 = vmatprep.subr.bf16.mxu0 %v1851_v0 }
  0x62   :  { %1571 = vmatpush3.bf16.msra.mxu0 %v1971_v30 }
  0x63   :  { %1572 = vmatprep.subr.bf16.mxu0 %v1851_v0 }
  0x66   :  { %1574 = vmatpush3.bf16.msra.mxu0 %v1977_v33 }
  0x67   :  { %1599 = vmatprep.subr.bf16.mxu0 %v1851_v0 }
 0x106   :  { %v1185_v35 = vpop.f32.mrb[0].mxu1 }
 0x107   :  { %v162_v36 = vpop.f32.mrb[1].mxu1  ;;  %v168_v48 = vadd.f32 %v1185_v35, %v2018_v37 }
 0x108   :  { %v163_v38 = vadd.f32 %v2018_v37, %v162_v36  ;;  %v853_v36 = vld [vmem:[#allocation7 + $0x70] sm:$0xff] }
 0x10a   :  { %v1188_v53 = vpop.f32.mrb[2].mxu1 }
 0x10b   :  { %v172_v54 = vpop.f32.mrb[3].mxu1  ;;  %v178_v2 = vadd.f32 %v1188_v53, %v2018_v37 }
 0x10c   :  { %v173_v59 = vadd.f32 %v2018_v37, %v172_v54 }
 0x10e   :  { %v2086_v55 = vpop.f32.mrb[4].mxu1 }
 0x10f   :  { %v182_v56 = vpop.f32.mrb[5].mxu1  ;;  %v188_v14 = vadd.f32 %v2086_v55, %v2018_v37 }
 0x110   :  { %v183_v9 = vadd.f32 %v2018_v37, %v182_v56 }
 0x112   :  { %v2088_v57 = vpop.f32.mrb[6].mxu1 }
 0x113   :  { %v2090_v58 = vpop.f32.mrb[7].mxu1 }
 0x11c   :  { %v292_v39 = vpop.f32.mrb[0].mxu0 }
 0x11d   :  { %v296_v40 = vadd.f32 %v292_v39, %v163_v38  ;;  %v1229_v41 = vpop.f32.mrb[1].mxu0  ;;  %v854_v38 = vld [vmem:[#allocation7 + $0x78] sm:$0xff] }
 0x11e   :  { %v1747_v39 = vpack.c.bf16 %v854_v38, %v853_v36 }
 0x11f   :  { %1759 = vtanh.f32 %v296_v40  ;;  %v193_v40 = vadd.f32 %v2018_v37, %v2090_v58 }
 0x129   :  { %v2021_v42 = vpop.eup %1759 }
 0x12a   :  { %1263 = vmatmul.mubr.f32.vlgmr.msra.gmra.mrb[2].mxu0 %v2021_v42 }
 0x12b   :  { %1601 = vmatpush3.bf16.msra.mxu0 %v1923_v5  ;;  %1332 = vmatprep.mubr.msk.f32.mxu0 %vm1852_vm0, %v1853_v1 }
 0x12c   :  { %1602 = vmatprep.subr.bf16.mxu0 %v1851_v0 }
 0x12f   :  { %1604 = vmatpush3.bf16.msra.mxu0 %v1926_v7 }
 0x130   :  { %1605 = vmatprep.subr.bf16.mxu0 %v1851_v0 }
 0x133   :  { %1607 = vmatpush3.bf16.msra.mxu0 %v1945_v17 }
 0x134   :  { %1608 = vmatprep.subr.bf16.mxu0 %v1851_v0 }
 0x137   :  { %1610 = vmatpush3.bf16.msra.mxu0 %v1950_v20 }
 0x138   :  { %1611 = vmatprep.subr.bf16.mxu0 %v1851_v0 }
 0x13b   :  { %1613 = vmatpush3.bf16.msra.mxu0 %v1959_v24 }
 0x13c   :  { %1614 = vmatprep.subr.bf16.mxu0 %v1851_v0 }
 0x13f   :  { %1616 = vmatpush3.bf16.msra.mxu0 %v1965_v27 }
 0x140   :  { %1617 = vmatprep.subr.bf16.mxu0 %v1851_v0 }
 0x143   :  { %1619 = vmatpush3.bf16.msra.mxu0 %v1971_v30 }
 0x144   :  { %1620 = vmatprep.subr.bf16.mxu0 %v1851_v0 }
 0x147   :  { %1622 = vmatpush3.bf16.msra.mxu0 %v1977_v33 }
 0x148   :  { %1647 = vmatprep.subr.bf16.mxu0 %v1851_v0 }
 0x1fd   :  { %v367_v49 = vpop.f32.mrb[2].mxu0 }
 0x1fe   :  { %v371_v50 = vadd.f32 %v367_v49, %v168_v48  ;;  %v1264_v51 = vpop.f32.mrb[3].mxu0 }
 0x200   :  { %1761 = vtanh.f32 %v371_v50 }
 0x20a   :  { %v2065_v52 = vpop.eup %1761 }
 0x20b   :  { %1298 = vmatmul.mubr.f32.vlgmr.msra.gmra.mrb[8].mxu1 %v2065_v52 }
 0x20c   :  { %1625 = vmatpush3.bf16.msra.mxu1 %v1923_v5  ;;  %1367 = vmatprep.mubr.msk.f32.mxu1 %vm1852_vm0, %v1853_v1 }
 0x20d   :  { %1626 = vmatprep.subr.bf16.mxu1 %v1851_v0 }
 0x210   :  { %1628 = vmatpush3.bf16.msra.mxu1 %v1926_v7 }
 0x211   :  { %1629 = vmatprep.subr.bf16.mxu1 %v1851_v0 }
 0x214   :  { %1631 = vmatpush3.bf16.msra.mxu1 %v1945_v17 }
 0x215   :  { %1632 = vmatprep.subr.bf16.mxu1 %v1851_v0 }
 0x218   :  { %1634 = vmatpush3.bf16.msra.mxu1 %v1950_v20 }
 0x219   :  { %1635 = vmatprep.subr.bf16.mxu1 %v1851_v0 }
 0x21c   :  { %1637 = vmatpush3.bf16.msra.mxu1 %v1959_v24 }
 0x21d   :  { %1638 = vmatprep.subr.bf16.mxu1 %v1851_v0 }
 0x220   :  { %1640 = vmatpush3.bf16.msra.mxu1 %v1965_v27 }
 0x221   :  { %1641 = vmatprep.subr.bf16.mxu1 %v1851_v0 }
 0x224   :  { %1643 = vmatpush3.bf16.msra.mxu1 %v1971_v30 }
 0x225   :  { %1644 = vmatprep.subr.bf16.mxu1 %v1851_v0 }
 0x228   :  { %1646 = vmatpush3.bf16.msra.mxu1 %v1977_v33 }
 0x229   :  { %1671 = vmatprep.subr.bf16.mxu1 %v1851_v0 }
 0x2de   :  { %v443_v60 = vpop.f32.mrb[8].mxu1 }
 0x2df   :  { %v447_v61 = vadd.f32 %v443_v60, %v173_v59  ;;  %v1299_v62 = vpop.f32.mrb[9].mxu1  ;;  %v198_v59 = vadd.f32 %v2088_v57, %v2018_v37 }
 0x2e1   :  { %1763 = vtanh.f32 %v447_v61 }
 0x2eb   :  { %v2093_v63 = vpop.eup %1763 }
 0x2ec   :  { %1333 = vmatmul.mubr.f32.vlgmr.msra.gmra.mrb[4].mxu0 %v2093_v63 }
 0x2ed   :  { %1649 = vmatpush3.bf16.msra.mxu0 %v1923_v5  ;;  %1402 = vmatprep.mubr.msk.f32.mxu0 %vm1852_vm0, %v1853_v1 }
 0x2ee   :  { %1650 = vmatprep.subr.bf16.mxu0 %v1851_v0 }
 0x2f1   :  { %1652 = vmatpush3.bf16.msra.mxu0 %v1926_v7 }
 0x2f2   :  { %1653 = vmatprep.subr.bf16.mxu0 %v1851_v0 }
 0x2f5   :  { %1655 = vmatpush3.bf16.msra.mxu0 %v1945_v17 }
 0x2f6   :  { %1656 = vmatprep.subr.bf16.mxu0 %v1851_v0 }
 0x2f9   :  { %1658 = vmatpush3.bf16.msra.mxu0 %v1950_v20 }
 0x2fa   :  { %1659 = vmatprep.subr.bf16.mxu0 %v1851_v0 }
 0x2fd   :  { %1661 = vmatpush3.bf16.msra.mxu0 %v1959_v24 }
 0x2fe   :  { %1662 = vmatprep.subr.bf16.mxu0 %v1851_v0 }
 0x301   :  { %1664 = vmatpush3.bf16.msra.mxu0 %v1965_v27 }
 0x302   :  { %1665 = vmatprep.subr.bf16.mxu0 %v1851_v0 }
 0x305   :  { %1667 = vmatpush3.bf16.msra.mxu0 %v1971_v30 }
 0x306   :  { %1668 = vmatprep.subr.bf16.mxu0 %v1851_v0 }
 0x309   :  { %1670 = vmatpush3.bf16.msra.mxu0 %v1977_v33 }
 0x30a   :  { %1695 = vmatprep.subr.bf16.mxu0 %v1851_v0 }
 0x3bf   :  { %v519_v3 = vpop.f32.mrb[4].mxu0 }
 0x3c0   :  { %v523_v4 = vadd.f32 %v519_v3, %v178_v2  ;;  %v1334_v6 = vpop.f32.mrb[5].mxu0 }
 0x3c2   :  { %1765 = vtanh.f32 %v523_v4 }
 0x3cc   :  { %v2115_v8 = vpop.eup %1765 }
 0x3cd   :  { %1368 = vmatmul.mubr.f32.vlgmr.msra.gmra.mrb[10].mxu1 %v2115_v8 }
 0x3ce   :  { %1673 = vmatpush3.bf16.msra.mxu1 %v1923_v5  ;;  %1437 = vmatprep.mubr.msk.f32.mxu1 %vm1852_vm0, %v1853_v1 }
 0x3cf   :  { %1674 = vmatprep.subr.bf16.mxu1 %v1851_v0 }
 0x3d2   :  { %1676 = vmatpush3.bf16.msra.mxu1 %v1926_v7 }
 0x3d3   :  { %1677 = vmatprep.subr.bf16.mxu1 %v1851_v0 }
 0x3d6   :  { %1679 = vmatpush3.bf16.msra.mxu1 %v1945_v17 }
 0x3d7   :  { %1680 = vmatprep.subr.bf16.mxu1 %v1851_v0 }
 0x3da   :  { %1682 = vmatpush3.bf16.msra.mxu1 %v1950_v20 }
 0x3db   :  { %1683 = vmatprep.subr.bf16.mxu1 %v1851_v0 }
 0x3de   :  { %1685 = vmatpush3.bf16.msra.mxu1 %v1959_v24 }
 0x3df   :  { %1686 = vmatprep.subr.bf16.mxu1 %v1851_v0 }
 0x3e2   :  { %1688 = vmatpush3.bf16.msra.mxu1 %v1965_v27 }
 0x3e3   :  { %1689 = vmatprep.subr.bf16.mxu1 %v1851_v0 }
 0x3e6   :  { %1691 = vmatpush3.bf16.msra.mxu1 %v1971_v30 }
 0x3e7   :  { %1692 = vmatprep.subr.bf16.mxu1 %v1851_v0 }
 0x3ea   :  { %1694 = vmatpush3.bf16.msra.mxu1 %v1977_v33 }
 0x4a0   :  { %v595_v10 = vpop.f32.mrb[10].mxu1 }
 0x4a1   :  { %v599_v11 = vadd.f32 %v595_v10, %v183_v9  ;;  %v1369_v12 = vpop.f32.mrb[11].mxu1 }
 0x4a3   :  { %1767 = vtanh.f32 %v599_v11 }
 0x4ad   :  { %v2136_v13 = vpop.eup %1767 }
 0x4ae   :  { %1403 = vmatmul.mubr.f32.vlgmr.msra.gmra.mrb[6].mxu0 %v2136_v13 }
 0x4af   :  { %1697 = vmatpush3.bf16.msra.mxu0 %v1923_v5  ;;  %1472 = vmatprep.mubr.msk.f32.mxu0 %vm1852_vm0, %v1853_v1  ;;  %v839_v1 = vld [vmem:[#allocation7] sm:$0xff]  ;;  %v840_v5 = vld [vmem:[#allocation7 + $0x8] sm:$0xff] }
 0x4b0   :  { %1698 = vmatprep.subr.bf16.mxu0 %v1851_v0 }
 0x4b3   :  { %1700 = vmatpush3.bf16.msra.mxu0 %v1926_v7  ;;  %v1719_v7 = vpack.c.bf16 %v840_v5, %v839_v1 }
 0x4b4   :  { %1701 = vmatprep.subr.bf16.mxu0 %v1851_v0 }
 0x4b5   :  { %1720 = vmatprep.subr.bf16.mxu1 %v1719_v7 }
 0x4b7   :  { %1703 = vmatpush3.bf16.msra.mxu0 %v1945_v17 }
 0x4b8   :  { %1704 = vmatprep.subr.bf16.mxu0 %v1851_v0 }
 0x4bb   :  { %1706 = vmatpush3.bf16.msra.mxu0 %v1950_v20  ;;  %v1723_v20 = vpack.c.bf16 %v842_v19, %v841_v18 }
 0x4bc   :  { %1707 = vmatprep.subr.bf16.mxu0 %v1851_v0 }
 0x4bf   :  { %1709 = vmatpush3.bf16.msra.mxu0 %v1959_v24  ;;  %v845_v24 = vld [vmem:[#allocation7 + $0x30] sm:$0xff] }
 0x4c0   :  { %1710 = vmatprep.subr.bf16.mxu0 %v1851_v0  ;;  %v1731_v26 = vpack.c.bf16 %v846_v25, %v845_v24 }
 0x4c3   :  { %1712 = vmatpush3.bf16.msra.mxu0 %v1965_v27  ;;  %v847_v27 = vld [vmem:[#allocation7 + $0x40] sm:$0xff] }
 0x4c4   :  { %1713 = vmatprep.subr.bf16.mxu0 %v1851_v0  ;;  %v1735_v29 = vpack.c.bf16 %v848_v28, %v847_v27 }
 0x4c7   :  { %1715 = vmatpush3.bf16.msra.mxu0 %v1971_v30  ;;  %v849_v30 = vld [vmem:[#allocation7 + $0x50] sm:$0xff] }
 0x4c8   :  { %1716 = vmatprep.subr.bf16.mxu0 %v1851_v0  ;;  %v1727_v0 = vpack.c.bf16 %v844_v23, %v843_v22  ;;  %v1739_v32 = vpack.c.bf16 %v850_v31, %v849_v30 }
 0x4cb   :  { %1718 = vmatpush3.bf16.msra.mxu0 %v1977_v33  ;;  %v851_v33 = vld [vmem:[#allocation7 + $0x60] sm:$0xff] }
 0x4cc   :  { %v1743_v35 = vpack.c.bf16 %v852_v34, %v851_v33 }
 0x581   :  { %v671_v15 = vpop.f32.mrb[6].mxu0 }
 0x582   :  { %v675_v16 = vadd.f32 %v671_v15, %v188_v14  ;;  %v1404_v17 = vpop.f32.mrb[7].mxu0 }
 0x584   :  { %1769 = vtanh.f32 %v675_v16 }
 0x58e   :  { %v1770_v21 = vpop.eup %1769 }
 0x58f   :  { %1438 = vmatmul.mubr.f32.vlgmr.msra.gmra.mrb[12].mxu1 %v1770_v21 }
 0x590   :  { %1722 = vmatpush3.bf16.msra.mxu1 %v1719_v7  ;;  %1507 = vmatprep.mubr.f32.mxu1 %v2021_v42 }
 0x591   :  { %1724 = vmatprep.subr.bf16.mxu1 %v1723_v20 }
 0x594   :  { %1726 = vmatpush3.bf16.msra.mxu1 %v1723_v20 }
 0x595   :  { %1728 = vmatprep.subr.bf16.mxu1 %v1727_v0 }
 0x598   :  { %1730 = vmatpush3.bf16.msra.mxu1 %v1727_v0 }
 0x599   :  { %1732 = vmatprep.subr.bf16.mxu1 %v1731_v26 }
 0x59c   :  { %1734 = vmatpush3.bf16.msra.mxu1 %v1731_v26 }
 0x59d   :  { %1736 = vmatprep.subr.bf16.mxu1 %v1735_v29 }
 0x5a0   :  { %1738 = vmatpush3.bf16.msra.mxu1 %v1735_v29 }
 0x5a1   :  { %1740 = vmatprep.subr.bf16.mxu1 %v1739_v32 }
 0x5a4   :  { %1742 = vmatpush3.bf16.msra.mxu1 %v1739_v32 }
 0x5a5   :  { %1744 = vmatprep.subr.bf16.mxu1 %v1743_v35 }
 0x5a8   :  { %1746 = vmatpush3.bf16.msra.mxu1 %v1743_v35 }
 0x5a9   :  { %1748 = vmatprep.subr.bf16.mxu1 %v1747_v39 }
 0x5ac   :  { %1750 = vmatpush3.bf16.msra.mxu1 %v1747_v39 }
 0x5af   :  { %1508 = vmatmul.mubr.f32.vlgmr.msra.gmra.mrb[14].mxu1 %v2065_v52 }
 0x5b0   :  { %1510 = vmatprep.mubr.f32.mxu1 %v2093_v63 }
 0x5b3   :  { %1511 = vmatmul.mubr.f32.gmra.mrb[16].mxu1 %v2115_v8 }
 0x5b4   :  { %1513 = vmatprep.mubr.f32.mxu1 %v2136_v13 }
 0x5b7   :  { %1514 = vmatmul.mubr.f32.gmra.mrb[18].mxu1 %v1770_v21 }
 0x662   :  { %v747_v41 = vpop.f32.mrb[12].mxu1 }
 0x663   :  { %v751_v42 = vadd.f32 %v747_v41, %v193_v40  ;;  %v1439_v43 = vpop.f32.mrb[13].mxu1 }
 0x665   :  { %1771 = vtanh.f32 %v751_v42 }
 0x66f   :  { %v1772_v44 = vpop.eup %1771 }
 0x670   :  { %1473 = vmatmul.mubr.f32.vlgmr.msra.gmra.mrb[8].mxu0 %v1772_v44  ;;  %1516 = vmatprep.mubr.f32.mxu1 %v1772_v44 }
 0x682   :  { %v1509_v46 = vpop.f32.mrb[14].mxu1 }
 0x683   :  { %v934_v47 = vadd.f32 %v1509_v46, %v1002_v45  ;;  %v928_v48 = vpop.f32.mrb[15].mxu1 }
 0x684   :  { %v929_v49 = vadd.f32 %v1002_v45, %v928_v48 }
 0x685   :  { %968 = vst [vmem:[#allocation9 + $0x8] sm:$0xff] %v934_v47 }
 0x686   :  { %967 = vst [vmem:[#allocation9] sm:$0xff] %v929_v49  ;;  %v1512_v50 = vpop.f32.mrb[16].mxu1 }
 0x687   :  { %v944_v51 = vadd.f32 %v1512_v50, %v1002_v45  ;;  %v938_v52 = vpop.f32.mrb[17].mxu1 }
 0x688   :  { %v939_v53 = vadd.f32 %v1002_v45, %v938_v52 }
 0x689   :  { %970 = vst [vmem:[#allocation9 + $0x18] sm:$0xff] %v944_v51 }
 0x68a   :  { %969 = vst [vmem:[#allocation9 + $0x10] sm:$0xff] %v939_v53  ;;  %v1515_v54 = vpop.f32.mrb[18].mxu1 }
 0x68b   :  { %v954_v55 = vadd.f32 %v1515_v54, %v1002_v45  ;;  %v948_v56 = vpop.f32.mrb[19].mxu1 }
 0x68c   :  { %v949_v58 = vadd.f32 %v1002_v45, %v948_v56 }
 0x68d   :  { %972 = vst [vmem:[#allocation9 + $0x28] sm:$0xff] %v954_v55 }
 0x68e   :  { %971 = vst [vmem:[#allocation9 + $0x20] sm:$0xff] %v949_v58 }
 0x743   :  { %v823_v60 = vpop.f32.mrb[8].mxu0 }
 0x744   :  { %v827_v61 = vadd.f32 %v823_v60, %v198_v59  ;;  %v1474_v62 = vpop.f32.mrb[9].mxu0 }
 0x746   :  { %1773 = vtanh.f32 %v827_v61 }
 0x750   :  { %v1774_v63 = vpop.eup %1773 }
 0x751   :  { %1517 = vmatmul.mubr.f32.gmra.mrb[20].mxu1 %v1774_v63 }
 0x824   :  { %v1518_v2 = vpop.f32.mrb[20].mxu1 }
 0x825   :  { %v964_v3 = vadd.f32 %v1518_v2, %v1002_v45  ;;  %v958_v4 = vpop.f32.mrb[21].mxu1 }
 0x826   :  { %v959_v6 = vadd.f32 %v1002_v45, %v958_v4 }
 0x827   :  { %974 = vst [vmem:[#allocation9 + $0x38] sm:$0xff] %v964_v3 }
 0x828   :  { %973 = vst [vmem:[#allocation9 + $0x30] sm:$0xff] %v959_v6 }
 0x829   :  { %1830 = shalt.err (!%p1827_p6)
}
 0x82a   :  { %s1831_s26 = scalar_lea.hbm %s2191_s6, 1024 }
 0x82b   :  { %p1832_p7 = scmp.ne.s32.totalorder %s2191_s6, %s1831_s26  ;;  %p1835_p8 = scmp.lt.u32.totalorder %s1831_s26, %s2191_s6 }
 0x82d   :  { %p1837_p9 = pnand %p1835_p8, %p1832_p7 }
 0x82f   :  { %1840 = shalt.err (!%p1837_p9)
}
 0x830   :  { %986 = dma.vmem_to_hbm [thread:$0]  %s981_s22, 1024, %s2191_s6, [#allocation6], %s1848_s7, %s1848_s7, %s1849_s8  }
 0x831   :  { %1845 = dma.done.wait [#allocation6], 1024  }
 0x832   :  { %1846 = vsyncadd [#allocation6], 4294966272 }
 0x833   :  { %990 = vsyncpa [#allocation5], 1 }
 0x834   :  { %991 = vsyncpa [#allocation8], 1 }
 0x835   :  { %992 = vsyncpa [#allocation6], 1 }

</bundles_post_ra>
